<compile_context>
chip_gen: v5e
topology: v5e:2x2
jax: 0.10.0
libtpu: 0.0.40
codegen_flags: <defaults>
</compile_context>

<pallas_src>
import functools
import math

import jax
import jax.numpy as jnp
from jax.experimental import pallas as pl
from jax.experimental.pallas import tpu as pltpu


def _round_up(x, m):
    return ((x + m - 1) // m) * m


def _cdiv(a, b):
    return -(-a // b)


# ------------------------------------------------------------------ kernel ---
def rainbow_kernel(x_ref, mask_ref, wh_ref, bh_ref, wo_ref, bo_ref, q_ref, *,
                   atoms, action_size, log):
    """x_ref:[TB,P] bf16, mask_ref:[TB,P] bf16 (0/1), wh_ref:[3,P,P] bf16,
    bh_ref:[3,1,P] f32, wo_ref:[P,A*PO] bf16, bo_ref:[1,A*PO] f32,
    q_ref:[TB,A*PO] f32."""
    f32 = jnp.float32
    bf16 = jnp.bfloat16

    x = x_ref[...]                                                 # bf16 [TB, P]

    # layer 0: fused self-encoder + block-replicated object-encoder, ReLU,
    # then masked_fill(mask == 0, 0) as a multiply by the {0,1} mask.
    h = jnp.maximum(jnp.dot(x, wh_ref[0], preferred_element_type=f32)
                    + bh_ref[0], 0.0)
    h = h * mask_ref[...].astype(f32)

    # layers 1, 2: fused value||advantage hidden layers (block-diagonal).
    h = jnp.maximum(jnp.dot(h.astype(bf16), wh_ref[1],
                            preferred_element_type=f32) + bh_ref[1], 0.0)
    h = jnp.maximum(jnp.dot(h.astype(bf16), wh_ref[2],
                            preferred_element_type=f32) + bh_ref[2], 0.0)

    # layer 3: dueling combine (v + a - mean_a) is pre-fused into the packed
    # weights; column group i*PO..i*PO+atoms holds q[:, i, :] directly.
    o = jnp.dot(h.astype(bf16), wo_ref[...],
                preferred_element_type=f32) + bo_ref[...]          # [TB, A*PO]

    tb = o.shape[0]
    po = o.shape[1] // action_size
    lane = jax.lax.broadcasted_iota(jnp.int32, (tb, po), 1)
    atom_mask = lane < atoms
    neg = jnp.float32(-1e30)

    # Per-action (log-)softmax over atoms on lane-aligned 128-wide groups.
    for i in range(action_size):
        qi = jnp.where(atom_mask, o[:, i * po:(i + 1) * po], neg)
        qmax = jnp.max(qi, axis=-1, keepdims=True)
        e = jnp.exp(qi - qmax)
        s = jnp.sum(e, axis=-1, keepdims=True)
        if log:
            out_i = qi - qmax - jnp.log(s)
        else:
            out_i = e / s                       # exact normalization
        q_ref[:, i * po:(i + 1) * po] = out_i.astype(q_ref.dtype)


# ----------------------------------------------------------- param packing ---
def _linear_params(key, in_f, out_f):
    """PyTorch Linear / NoisyLinear mu init: U(-1/sqrt(in), 1/sqrt(in)).
    Returned as (W [in, out], b [out]) for x @ W + b."""
    bound = 1.0 / math.sqrt(in_f)
    kw, kb = jax.random.split(key)
    w = jax.random.uniform(kw, (out_f, in_f), jnp.float32, -bound, bound)
    b = jax.random.uniform(kb, (out_f,), jnp.float32, -bound, bound)
    return w.T, b


def init_rainbow_params(key, *, self_dimension, object_dimension,
                        self_feature_dimension, object_feature_dimension,
                        concat_feature_dimension, hidden_dimension,
                        action_size, atoms):
    keys = jax.random.split(key, 8)
    p = {}
    p["w_se"], p["b_se"] = _linear_params(keys[0], self_dimension, self_feature_dimension)
    p["w_oe"], p["b_oe"] = _linear_params(keys[1], object_dimension, object_feature_dimension)
    p["w_v1"], p["b_v1"] = _linear_params(keys[2], concat_feature_dimension, hidden_dimension)
    p["w_a1"], p["b_a1"] = _linear_params(keys[3], concat_feature_dimension, hidden_dimension)
    p["w_v2"], p["b_v2"] = _linear_params(keys[4], hidden_dimension, hidden_dimension)
    p["w_a2"], p["b_a2"] = _linear_params(keys[5], hidden_dimension, hidden_dimension)
    p["w_vo"], p["b_vo"] = _linear_params(keys[6], hidden_dimension, atoms)
    p["w_ao"], p["b_ao"] = _linear_params(keys[7], hidden_dimension, action_size * atoms)
    return p


def pack_params(p, *, self_dimension, object_dimension, max_object_num,
                self_feature_dimension, object_feature_dimension,
                hidden_dimension, action_size, atoms):
    """Fuse/zero-pad all weights into:
        wh [3, P, P] bf16, bh [3, 1, P] f32   (hidden layers)
        wo [P, A*PO] bf16, bo [1, A*PO] f32   (output; dueling combine fused)
    Each action owns a 128-lane output group.  Done ONCE, not per call."""
    d_in = self_dimension + max_object_num * object_dimension
    feat = self_feature_dimension + max_object_num * object_feature_dimension
    h = hidden_dimension
    assert atoms <= 128, "atoms must fit in one 128-lane group"
    P = _round_up(max(d_in, feat, 2 * h), 128)
    PO = _round_up(atoms, 128)

    def zw():
        return jnp.zeros((P, P), jnp.float32)

    def zb():
        return jnp.zeros((P,), jnp.float32)

    # layer 0: self encoder + block-replicated object encoder (block diagonal)
    w0 = zw().at[:self_dimension, :self_feature_dimension].set(p["w_se"])
    b0 = zb().at[:self_feature_dimension].set(p["b_se"])
    for m in range(max_object_num):
        r = self_dimension + m * object_dimension
        c = self_feature_dimension + m * object_feature_dimension
        w0 = w0.at[r:r + object_dimension, c:c + object_feature_dimension].set(p["w_oe"])
        b0 = b0.at[c:c + object_feature_dimension].set(p["b_oe"])

    # layer 1: [feat -> 2H]  (value || advantage, side by side)
    w1 = zw().at[:feat, :h].set(p["w_v1"]).at[:feat, h:2 * h].set(p["w_a1"])
    b1 = zb().at[:h].set(p["b_v1"]).at[h:2 * h].set(p["b_a1"])

    # layer 2: block-diagonal [2H -> 2H]
    w2 = zw().at[:h, :h].set(p["w_v2"]).at[h:2 * h, h:2 * h].set(p["w_a2"])
    b2 = zb().at[:h].set(p["b_v2"]).at[h:2 * h].set(p["b_a2"])

    wh = jnp.stack([w0, w1, w2]).astype(jnp.bfloat16)             # [3, P, P]
    bh = jnp.stack([b0, b1, b2])[:, None, :].astype(jnp.float32)  # [3, 1, P]

    # layer 3: dueling combine fused into the weights.
    #   q[:, i, k] = hv·Wvo[:,k] + ha·(Wao_i[:,k] - mean_j Wao_j[:,k])
    #               + bvo[k] + bao_i[k] - mean_j bao_j[k]
    w_ao = p["w_ao"].reshape(h, action_size, atoms)
    b_ao = p["b_ao"].reshape(action_size, atoms)
    w_ao_c = w_ao - w_ao.mean(axis=1, keepdims=True)
    b_ao_c = b_ao - b_ao.mean(axis=0, keepdims=True)

    wo = jnp.zeros((P, action_size * PO), jnp.float32)
    bo = jnp.zeros((1, action_size * PO), jnp.float32)
    for i in range(action_size):
        c = i * PO
        wo = wo.at[:h, c:c + atoms].set(p["w_vo"])
        wo = wo.at[h:2 * h, c:c + atoms].set(w_ao_c[:, i, :])
        bo = bo.at[0, c:c + atoms].set(p["b_vo"] + b_ao_c[i])

    return wh, bh, wo.astype(jnp.bfloat16), bo.astype(jnp.float32)


# ----------------------------------------------------------------- wrapper ---
def rainbow_forward(wh, bh, wo, bo, x1, x2, x2_mask, *,
                    self_dimension, object_dimension, max_object_num,
                    self_feature_dimension, object_feature_dimension,
                    action_size, atoms, log=False):
    """x1: [B, self_dim], x2: [B, M, obj_dim] or None, x2_mask: [B, M]."""
    f32, bf16 = jnp.float32, jnp.bfloat16
    B = x1.shape[0]
    P = wh.shape[1]
    PO = wo.shape[1] // action_size
    obj_out = max_object_num * object_feature_dimension

    # ---- pack inputs lane-dense in bf16 (concat, minimal XLA passes) --------
    parts = [x1.astype(bf16)]
    if x2 is not None:
        parts.append(x2.reshape(B, -1).astype(bf16))
        in_used = self_dimension + max_object_num * object_dimension
    else:
        in_used = self_dimension
    if P > in_used:
        parts.append(jnp.zeros((B, P - in_used), bf16))
    x_in = jnp.concatenate(parts, axis=1)

    if x2 is not None:
        # {0,1} multiplier == masked_fill(mask == 0, 0) semantics
        mobj = jnp.repeat((x2_mask != 0).astype(bf16),
                          object_feature_dimension, axis=1)        # [B, M*obj_feat]
    else:
        mobj = jnp.zeros((B, obj_out), bf16)
    mask_in = jnp.concatenate(
        [jnp.ones((B, self_feature_dimension), bf16), mobj,
         jnp.ones((B, P - self_feature_dimension - obj_out), bf16)], axis=1)

    # ---- batch tiling: TB multiple of 16 (bf16), grid >= 2 when possible ----
    TB_MIN, TB_CAP = 16, 1024
    if B <= TB_MIN:
        TB = TB_MIN
    else:
        n_steps = max(2, _cdiv(B, TB_CAP))          # >=2 steps -> both v7x TCs
        TB = min(TB_CAP, _round_up(_cdiv(B, n_steps), TB_MIN))
    B_pad = _round_up(B, TB)
    if B_pad != B:
        x_in = jnp.pad(x_in, ((0, B_pad - B), (0, 0)))
        mask_in = jnp.pad(mask_in, ((0, B_pad - B), (0, 0)))

    out_cols = action_size * PO
    kernel = functools.partial(rainbow_kernel, atoms=atoms,
                               action_size=action_size, log=log)

    q_flat = pl.pallas_call(
        kernel,
        out_shape=jax.ShapeDtypeStruct((B_pad, out_cols), jnp.float32),
        grid=(B_pad // TB,),
        in_specs=[
            pl.BlockSpec((TB, P), lambda i: (i, 0)),           # activations (bf16)
            pl.BlockSpec((TB, P), lambda i: (i, 0)),           # mask (bf16)
            pl.BlockSpec((3, P, P), lambda i: (0, 0, 0)),      # hidden weights: resident
            pl.BlockSpec((3, 1, P), lambda i: (0, 0, 0)),      # hidden biases:  resident
            pl.BlockSpec((P, out_cols), lambda i: (0, 0)),     # output weights: resident
            pl.BlockSpec((1, out_cols), lambda i: (0, 0)),     # output bias:    resident
        ],
        out_specs=pl.BlockSpec((TB, out_cols), lambda i: (i, 0)),
        compiler_params=pltpu.CompilerParams(
            dimension_semantics=("parallel",),
            vmem_limit_bytes=48 * 1024 * 1024),
    )(x_in, mask_in, wh, bh, wo, bo)

    # lane-dense [B_pad, A*PO] -> [B, A, atoms]
    return q_flat[:B].reshape(B, action_size, PO)[:, :, :atoms]


# --------------------------------------------------------- pure-JAX reference
def rainbow_reference(p, x1, x2, x2_mask, *, max_object_num,
                      object_feature_dimension, action_size, atoms, log=False):
    B = x1.shape[0]
    x1f = jax.nn.relu(x1 @ p["w_se"] + p["b_se"])
    if x2 is None:
        x2f = jnp.zeros((B, max_object_num * object_feature_dimension), jnp.float32)
    else:
        x2f = jax.nn.relu(x2 @ p["w_oe"] + p["b_oe"])
        x2f = jnp.where(x2_mask[:, :, None] == 0, 0.0, x2f)
        x2f = x2f.reshape(B, -1)
    feats = jnp.concatenate([x1f, x2f], axis=1)
    hv = jax.nn.relu(feats @ p["w_v1"] + p["b_v1"])
    hv = jax.nn.relu(hv @ p["w_v2"] + p["b_v2"])
    v = hv @ p["w_vo"] + p["b_vo"]
    ha = jax.nn.relu(feats @ p["w_a1"] + p["b_a1"])
    ha = jax.nn.relu(ha @ p["w_a2"] + p["b_a2"])
    a = (ha @ p["w_ao"] + p["b_ao"]).reshape(B, action_size, atoms)
    q = v[:, None, :] + a - a.mean(axis=1, keepdims=True)
    return jax.nn.log_softmax(q, axis=2) if log else jax.nn.softmax(q, axis=2)


# -------------------------------------------------------------------- main ---
if __name__ == "__main__":
    self_dimension = 8
    object_dimension = 6
    max_object_num = 4
    self_feature_dimension = 16
    object_feature_dimension = 8
    concat_feature_dimension = (self_feature_dimension
                                + max_object_num * object_feature_dimension)  # 48
    hidden_dimension = 32
    action_size = 5
    atoms = 11
    batch = 2

    key = jax.random.PRNGKey(0)
    k_params, k_x1, k_x2, k_mask = jax.random.split(key, 4)

    dims = dict(self_dimension=self_dimension,
                object_dimension=object_dimension,
                max_object_num=max_object_num,
                self_feature_dimension=self_feature_dimension,
                object_feature_dimension=object_feature_dimension,
                action_size=action_size, atoms=atoms)

    params = init_rainbow_params(
        k_params,
        self_dimension=self_dimension,
        object_dimension=object_dimension,
        self_feature_dimension=self_feature_dimension,
        object_feature_dimension=object_feature_dimension,
        concat_feature_dimension=concat_feature_dimension,
        hidden_dimension=hidden_dimension,
        action_size=action_size,
        atoms=atoms,
    )
    wh, bh, wo, bo = pack_params(params, hidden_dimension=hidden_dimension, **dims)

    x1 = jax.random.normal(k_x1, (batch, self_dimension), jnp.float32)
    x2 = jax.random.normal(k_x2, (batch, max_object_num, object_dimension), jnp.float32)
    x2_mask = (jax.random.uniform(k_mask, (batch, max_object_num)) > 0.3).astype(jnp.float32)

    # ---- softmax head ----
    q = rainbow_forward(wh, bh, wo, bo, x1, x2, x2_mask, log=False, **dims)
    jax.block_until_ready(q)
    q_ref = rainbow_reference(params, x1, x2, x2_mask,
                              max_object_num=max_object_num,
                              object_feature_dimension=object_feature_dimension,
                              action_size=action_size, atoms=atoms, log=False)
    assert q.shape == (batch, action_size, atoms)
    assert bool(jnp.allclose(jnp.sum(q, axis=2), 1.0, atol=1e-4))       # exact normalization
    assert bool(jnp.allclose(q, q_ref, atol=2e-2, rtol=2e-2))

    # ---- log-softmax head ----
    lq = rainbow_forward(wh, bh, wo, bo, x1, x2, x2_mask, log=True, **dims)
    jax.block_until_ready(lq)
    lq_ref = rainbow_reference(params, x1, x2, x2_mask,
                               max_object_num=max_object_num,
                               object_feature_dimension=object_feature_dimension,
                               action_size=action_size, atoms=atoms, log=True)
    assert bool(jnp.allclose(lq, lq_ref, atol=3e-2, rtol=3e-2))

    # ---- larger batch: exercises multi-tile grid (>= 2 steps) ----
    B2 = 40
    kx1, kx2, km = jax.random.split(jax.random.PRNGKey(1), 3)
    x1b = jax.random.normal(kx1, (B2, self_dimension), jnp.float32)
    x2b = jax.random.normal(kx2, (B2, max_object_num, object_dimension), jnp.float32)
    mb = (jax.random.uniform(km, (B2, max_object_num)) > 0.3).astype(jnp.float32)
    qb = rainbow_forward(wh, bh, wo, bo, x1b, x2b, mb, log=False, **dims)
    jax.block_until_ready(qb)
    qb_ref = rainbow_reference(params, x1b, x2b, mb,
                               max_object_num=max_object_num,
                               object_feature_dimension=object_feature_dimension,
                               action_size=action_size, atoms=atoms, log=False)
    assert qb.shape == (B2, action_size, atoms)
    assert bool(jnp.allclose(qb, qb_ref, atol=2e-2, rtol=2e-2))

    print("KERNEL_OK")
</pallas_src>

<mosaic_0001>
module attributes {stable_mosaic.version = 11 : i64} {
  func.func @rainbow_kernel(%arg0: i32, %arg1: memref<16x128xbf16, #tpu.memory_space<vmem>>, %arg2: memref<16x128xbf16, #tpu.memory_space<vmem>>, %arg3: memref<3x128x128xbf16, #tpu.memory_space<vmem>>, %arg4: memref<3x1x128xf32, #tpu.memory_space<vmem>>, %arg5: memref<128x640xbf16, #tpu.memory_space<vmem>>, %arg6: memref<1x640xf32, #tpu.memory_space<vmem>>, %arg7: memref<16x640xf32, #tpu.memory_space<vmem>>) attributes {dimension_semantics = [#tpu.dimension_semantics<parallel>], iteration_bounds = array<i64: 1>, scalar_prefetch = 0 : i64, scratch_operands = 0 : i64, tpu.core_type = #tpu.core_type<tc>, window_params = [{transform_indices = @transform_0, window_bounds = array<i64: 16, 128>}, {transform_indices = @transform_1, window_bounds = array<i64: 16, 128>}, {pipeline_mode = #tpu.pipeline_mode<synchronous>, transform_indices = @transform_2, window_bounds = array<i64: 3, 128, 128>}, {pipeline_mode = #tpu.pipeline_mode<synchronous>, transform_indices = @transform_3, window_bounds = array<i64: 3, 1, 128>}, {pipeline_mode = #tpu.pipeline_mode<synchronous>, transform_indices = @transform_4, window_bounds = array<i64: 128, 640>}, {pipeline_mode = #tpu.pipeline_mode<synchronous>, transform_indices = @transform_5, window_bounds = array<i64: 1, 640>}, {transform_indices = @transform_6, window_bounds = array<i64: 16, 640>}]} {
    %c0 = arith.constant 0 : index
    %c0_0 = arith.constant 0 : index
    %0 = vector.load %arg1[%c0, %c0_0] : memref<16x128xbf16, #tpu.memory_space<vmem>>, vector<16x128xbf16>
    %c0_1 = arith.constant 0 : index
    %c0_2 = arith.constant 0 : index
    %c0_3 = arith.constant 0 : index
    %1 = vector.load %arg3[%c0_1, %c0_2, %c0_3] : memref<3x128x128xbf16, #tpu.memory_space<vmem>>, vector<1x128x128xbf16>
    %2 = vector.shape_cast %1 : vector<1x128x128xbf16> to vector<128x128xbf16>
    %cst = arith.constant dense<0.000000e+00> : vector<16x128xf32>
    %3 = tpu.matmul %0, %2, %cst {dimension_numbers = #tpu.dot_dimension_numbers<[1], [0], [0], [1], [0, 0, 1, 1], [], []>} : vector<16x128xbf16>, vector<128x128xbf16>, vector<16x128xf32> -> vector<16x128xf32>
    %c0_4 = arith.constant 0 : index
    %c0_5 = arith.constant 0 : index
    %c0_6 = arith.constant 0 : index
    %4 = vector.load %arg4[%c0_4, %c0_5, %c0_6] : memref<3x1x128xf32, #tpu.memory_space<vmem>>, vector<1x1x128xf32>
    %5 = vector.shape_cast %4 : vector<1x1x128xf32> to vector<1x128xf32>
    %6 = vector.broadcast %5 : vector<1x128xf32> to vector<16x128xf32>
    %7 = arith.addf %3, %6 : vector<16x128xf32>
    %cst_7 = arith.constant 0.000000e+00 : f32
    %8 = vector.broadcast %cst_7 : f32 to vector<16x128xf32>
    %9 = arith.maximumf %7, %8 : vector<16x128xf32>
    %c0_8 = arith.constant 0 : index
    %c0_9 = arith.constant 0 : index
    %10 = vector.load %arg2[%c0_8, %c0_9] : memref<16x128xbf16, #tpu.memory_space<vmem>>, vector<16x128xbf16>
    %11 = arith.extf %10 : vector<16x128xbf16> to vector<16x128xf32>
    %12 = arith.mulf %9, %11 : vector<16x128xf32>
    %13 = arith.truncf %12 : vector<16x128xf32> to vector<16x128xbf16>
    %c1 = arith.constant 1 : index
    %c0_10 = arith.constant 0 : index
    %c0_11 = arith.constant 0 : index
    %14 = vector.load %arg3[%c1, %c0_10, %c0_11] : memref<3x128x128xbf16, #tpu.memory_space<vmem>>, vector<1x128x128xbf16>
    %15 = vector.shape_cast %14 : vector<1x128x128xbf16> to vector<128x128xbf16>
    %cst_12 = arith.constant dense<0.000000e+00> : vector<16x128xf32>
    %16 = tpu.matmul %13, %15, %cst_12 {dimension_numbers = #tpu.dot_dimension_numbers<[1], [0], [0], [1], [0, 0, 1, 1], [], []>} : vector<16x128xbf16>, vector<128x128xbf16>, vector<16x128xf32> -> vector<16x128xf32>
    %c1_13 = arith.constant 1 : index
    %c0_14 = arith.constant 0 : index
    %c0_15 = arith.constant 0 : index
    %17 = vector.load %arg4[%c1_13, %c0_14, %c0_15] : memref<3x1x128xf32, #tpu.memory_space<vmem>>, vector<1x1x128xf32>
    %18 = vector.shape_cast %17 : vector<1x1x128xf32> to vector<1x128xf32>
    %19 = vector.broadcast %18 : vector<1x128xf32> to vector<16x128xf32>
    %20 = arith.addf %16, %19 : vector<16x128xf32>
    %cst_16 = arith.constant 0.000000e+00 : f32
    %21 = vector.broadcast %cst_16 : f32 to vector<16x128xf32>
    %22 = arith.maximumf %20, %21 : vector<16x128xf32>
    %23 = arith.truncf %22 : vector<16x128xf32> to vector<16x128xbf16>
    %c2 = arith.constant 2 : index
    %c0_17 = arith.constant 0 : index
    %c0_18 = arith.constant 0 : index
    %24 = vector.load %arg3[%c2, %c0_17, %c0_18] : memref<3x128x128xbf16, #tpu.memory_space<vmem>>, vector<1x128x128xbf16>
    %25 = vector.shape_cast %24 : vector<1x128x128xbf16> to vector<128x128xbf16>
    %cst_19 = arith.constant dense<0.000000e+00> : vector<16x128xf32>
    %26 = tpu.matmul %23, %25, %cst_19 {dimension_numbers = #tpu.dot_dimension_numbers<[1], [0], [0], [1], [0, 0, 1, 1], [], []>} : vector<16x128xbf16>, vector<128x128xbf16>, vector<16x128xf32> -> vector<16x128xf32>
    %c2_20 = arith.constant 2 : index
    %c0_21 = arith.constant 0 : index
    %c0_22 = arith.constant 0 : index
    %27 = vector.load %arg4[%c2_20, %c0_21, %c0_22] : memref<3x1x128xf32, #tpu.memory_space<vmem>>, vector<1x1x128xf32>
    %28 = vector.shape_cast %27 : vector<1x1x128xf32> to vector<1x128xf32>
    %29 = vector.broadcast %28 : vector<1x128xf32> to vector<16x128xf32>
    %30 = arith.addf %26, %29 : vector<16x128xf32>
    %cst_23 = arith.constant 0.000000e+00 : f32
    %31 = vector.broadcast %cst_23 : f32 to vector<16x128xf32>
    %32 = arith.maximumf %30, %31 : vector<16x128xf32>
    %33 = arith.truncf %32 : vector<16x128xf32> to vector<16x128xbf16>
    %c0_24 = arith.constant 0 : index
    %c0_25 = arith.constant 0 : index
    %34 = vector.load %arg5[%c0_24, %c0_25] : memref<128x640xbf16, #tpu.memory_space<vmem>>, vector<128x640xbf16>
    %cst_26 = arith.constant dense<0.000000e+00> : vector<16x640xf32>
    %35 = tpu.matmul %33, %34, %cst_26 {dimension_numbers = #tpu.dot_dimension_numbers<[1], [0], [0], [1], [0, 0, 1, 1], [], []>} : vector<16x128xbf16>, vector<128x640xbf16>, vector<16x640xf32> -> vector<16x640xf32>
    %c0_27 = arith.constant 0 : index
    %c0_28 = arith.constant 0 : index
    %36 = vector.load %arg6[%c0_27, %c0_28] : memref<1x640xf32, #tpu.memory_space<vmem>>, vector<1x640xf32>
    %37 = vector.broadcast %36 : vector<1x640xf32> to vector<16x640xf32>
    %38 = arith.addf %35, %37 : vector<16x640xf32>
    %39 = tpu.iota {dimensions = array<i32: 1>} : vector<16x128xi32>
    %c11_i32 = arith.constant 11 : i32
    %40 = vector.broadcast %c11_i32 : i32 to vector<16x128xi32>
    %41 = arith.cmpi slt, %39, %40 : vector<16x128xi32>
    %42 = vector.extract_strided_slice %38 {offsets = [0, 0], sizes = [16, 128], strides = [1, 1]} : vector<16x640xf32> to vector<16x128xf32>
    %cst_29 = arith.constant -1.000000e+30 : f32
    %43 = vector.broadcast %cst_29 : f32 to vector<16x128xf32>
    %44 = arith.select %41, %42, %43 : vector<16x128xi1>, vector<16x128xf32>
    %cst_30 = arith.constant dense<0xFF800000> : vector<16xf32>
    %45 = vector.multi_reduction <maximumf>, %44, %cst_30 [1] : vector<16x128xf32> to vector<16xf32>
    %46 = vector.shape_cast %45 : vector<16xf32> to vector<16x1xf32>
    %47 = vector.broadcast %46 : vector<16x1xf32> to vector<16x128xf32>
    %48 = arith.subf %44, %47 : vector<16x128xf32>
    %49 = math.exp %48 : vector<16x128xf32>
    %cst_31 = arith.constant dense<0.000000e+00> : vector<16xf32>
    %50 = vector.multi_reduction <add>, %49, %cst_31 [1] : vector<16x128xf32> to vector<16xf32>
    %51 = vector.shape_cast %50 : vector<16xf32> to vector<16x1xf32>
    %52 = vector.broadcast %51 : vector<16x1xf32> to vector<16x128xf32>
    %53 = arith.divf %49, %52 : vector<16x128xf32>
    %c0_32 = arith.constant 0 : index
    %c0_33 = arith.constant 0 : index
    %54 = vector.load %arg7[%c0_32, %c0_33] : memref<16x640xf32, #tpu.memory_space<vmem>>, vector<16x128xf32>
    tpu.vector_store %arg7[%c0_32, %c0_33], %53 {strides = array<i32>} : memref<16x640xf32, #tpu.memory_space<vmem>>, vector<16x128xf32>,
    %55 = vector.extract_strided_slice %38 {offsets = [0, 128], sizes = [16, 128], strides = [1, 1]} : vector<16x640xf32> to vector<16x128xf32>
    %cst_34 = arith.constant -1.000000e+30 : f32
    %56 = vector.broadcast %cst_34 : f32 to vector<16x128xf32>
    %57 = arith.select %41, %55, %56 : vector<16x128xi1>, vector<16x128xf32>
    %cst_35 = arith.constant dense<0xFF800000> : vector<16xf32>
    %58 = vector.multi_reduction <maximumf>, %57, %cst_35 [1] : vector<16x128xf32> to vector<16xf32>
    %59 = vector.shape_cast %58 : vector<16xf32> to vector<16x1xf32>
    %60 = vector.broadcast %59 : vector<16x1xf32> to vector<16x128xf32>
    %61 = arith.subf %57, %60 : vector<16x128xf32>
    %62 = math.exp %61 : vector<16x128xf32>
    %cst_36 = arith.constant dense<0.000000e+00> : vector<16xf32>
    %63 = vector.multi_reduction <add>, %62, %cst_36 [1] : vector<16x128xf32> to vector<16xf32>
    %64 = vector.shape_cast %63 : vector<16xf32> to vector<16x1xf32>
    %65 = vector.broadcast %64 : vector<16x1xf32> to vector<16x128xf32>
    %66 = arith.divf %62, %65 : vector<16x128xf32>
    %c0_37 = arith.constant 0 : index
    %c128 = arith.constant 128 : index
    %67 = vector.load %arg7[%c0_37, %c128] : memref<16x640xf32, #tpu.memory_space<vmem>>, vector<16x128xf32>
    tpu.vector_store %arg7[%c0_37, %c128], %66 {strides = array<i32>} : memref<16x640xf32, #tpu.memory_space<vmem>>, vector<16x128xf32>,
    %68 = vector.extract_strided_slice %38 {offsets = [0, 256], sizes = [16, 128], strides = [1, 1]} : vector<16x640xf32> to vector<16x128xf32>
    %cst_38 = arith.constant -1.000000e+30 : f32
    %69 = vector.broadcast %cst_38 : f32 to vector<16x128xf32>
    %70 = arith.select %41, %68, %69 : vector<16x128xi1>, vector<16x128xf32>
    %cst_39 = arith.constant dense<0xFF800000> : vector<16xf32>
    %71 = vector.multi_reduction <maximumf>, %70, %cst_39 [1] : vector<16x128xf32> to vector<16xf32>
    %72 = vector.shape_cast %71 : vector<16xf32> to vector<16x1xf32>
    %73 = vector.broadcast %72 : vector<16x1xf32> to vector<16x128xf32>
    %74 = arith.subf %70, %73 : vector<16x128xf32>
    %75 = math.exp %74 : vector<16x128xf32>
    %cst_40 = arith.constant dense<0.000000e+00> : vector<16xf32>
    %76 = vector.multi_reduction <add>, %75, %cst_40 [1] : vector<16x128xf32> to vector<16xf32>
    %77 = vector.shape_cast %76 : vector<16xf32> to vector<16x1xf32>
    %78 = vector.broadcast %77 : vector<16x1xf32> to vector<16x128xf32>
    %79 = arith.divf %75, %78 : vector<16x128xf32>
    %c0_41 = arith.constant 0 : index
    %c256 = arith.constant 256 : index
    %80 = vector.load %arg7[%c0_41, %c256] : memref<16x640xf32, #tpu.memory_space<vmem>>, vector<16x128xf32>
    tpu.vector_store %arg7[%c0_41, %c256], %79 {strides = array<i32>} : memref<16x640xf32, #tpu.memory_space<vmem>>, vector<16x128xf32>,
    %81 = vector.extract_strided_slice %38 {offsets = [0, 384], sizes = [16, 128], strides = [1, 1]} : vector<16x640xf32> to vector<16x128xf32>
    %cst_42 = arith.constant -1.000000e+30 : f32
    %82 = vector.broadcast %cst_42 : f32 to vector<16x128xf32>
    %83 = arith.select %41, %81, %82 : vector<16x128xi1>, vector<16x128xf32>
    %cst_43 = arith.constant dense<0xFF800000> : vector<16xf32>
    %84 = vector.multi_reduction <maximumf>, %83, %cst_43 [1] : vector<16x128xf32> to vector<16xf32>
    %85 = vector.shape_cast %84 : vector<16xf32> to vector<16x1xf32>
    %86 = vector.broadcast %85 : vector<16x1xf32> to vector<16x128xf32>
    %87 = arith.subf %83, %86 : vector<16x128xf32>
    %88 = math.exp %87 : vector<16x128xf32>
    %cst_44 = arith.constant dense<0.000000e+00> : vector<16xf32>
    %89 = vector.multi_reduction <add>, %88, %cst_44 [1] : vector<16x128xf32> to vector<16xf32>
    %90 = vector.shape_cast %89 : vector<16xf32> to vector<16x1xf32>
    %91 = vector.broadcast %90 : vector<16x1xf32> to vector<16x128xf32>
    %92 = arith.divf %88, %91 : vector<16x128xf32>
    %c0_45 = arith.constant 0 : index
    %c384 = arith.constant 384 : index
    %93 = vector.load %arg7[%c0_45, %c384] : memref<16x640xf32, #tpu.memory_space<vmem>>, vector<16x128xf32>
    tpu.vector_store %arg7[%c0_45, %c384], %92 {strides = array<i32>} : memref<16x640xf32, #tpu.memory_space<vmem>>, vector<16x128xf32>,
    %94 = vector.extract_strided_slice %38 {offsets = [0, 512], sizes = [16, 128], strides = [1, 1]} : vector<16x640xf32> to vector<16x128xf32>
    %cst_46 = arith.constant -1.000000e+30 : f32
    %95 = vector.broadcast %cst_46 : f32 to vector<16x128xf32>
    %96 = arith.select %41, %94, %95 : vector<16x128xi1>, vector<16x128xf32>
    %cst_47 = arith.constant dense<0xFF800000> : vector<16xf32>
    %97 = vector.multi_reduction <maximumf>, %96, %cst_47 [1] : vector<16x128xf32> to vector<16xf32>
    %98 = vector.shape_cast %97 : vector<16xf32> to vector<16x1xf32>
    %99 = vector.broadcast %98 : vector<16x1xf32> to vector<16x128xf32>
    %100 = arith.subf %96, %99 : vector<16x128xf32>
    %101 = math.exp %100 : vector<16x128xf32>
    %cst_48 = arith.constant dense<0.000000e+00> : vector<16xf32>
    %102 = vector.multi_reduction <add>, %101, %cst_48 [1] : vector<16x128xf32> to vector<16xf32>
    %103 = vector.shape_cast %102 : vector<16xf32> to vector<16x1xf32>
    %104 = vector.broadcast %103 : vector<16x1xf32> to vector<16x128xf32>
    %105 = arith.divf %101, %104 : vector<16x128xf32>
    %c0_49 = arith.constant 0 : index
    %c512 = arith.constant 512 : index
    %106 = vector.load %arg7[%c0_49, %c512] : memref<16x640xf32, #tpu.memory_space<vmem>>, vector<16x128xf32>
    tpu.vector_store %arg7[%c0_49, %c512], %105 {strides = array<i32>} : memref<16x640xf32, #tpu.memory_space<vmem>>, vector<16x128xf32>,
    return
  }
  func.func @transform_0(%arg0: i32) -> (i32, i32) {
    %c0_i32 = arith.constant 0 : i32
    %c0_i32_0 = arith.constant 0 : i32
    return %arg0, %c0_i32 : i32, i32
  }
  func.func @transform_1(%arg0: i32) -> (i32, i32) {
    %c0_i32 = arith.constant 0 : i32
    %c0_i32_0 = arith.constant 0 : i32
    return %arg0, %c0_i32 : i32, i32
  }
  func.func @transform_2(%arg0: i32) -> (i32, i32, i32) {
    %c0_i32 = arith.constant 0 : i32
    %c0_i32_0 = arith.constant 0 : i32
    %c0_i32_1 = arith.constant 0 : i32
    %c0_i32_2 = arith.constant 0 : i32
    return %c0_i32, %c0_i32_0, %c0_i32_1 : i32, i32, i32
  }
  func.func @transform_3(%arg0: i32) -> (i32, i32, i32) {
    %c0_i32 = arith.constant 0 : i32
    %c0_i32_0 = arith.constant 0 : i32
    %c0_i32_1 = arith.constant 0 : i32
    %c0_i32_2 = arith.constant 0 : i32
    return %c0_i32, %c0_i32_0, %c0_i32_1 : i32, i32, i32
  }
  func.func @transform_4(%arg0: i32) -> (i32, i32) {
    %c0_i32 = arith.constant 0 : i32
    %c0_i32_0 = arith.constant 0 : i32
    %c0_i32_1 = arith.constant 0 : i32
    return %c0_i32, %c0_i32_0 : i32, i32
  }
  func.func @transform_5(%arg0: i32) -> (i32, i32) {
    %c0_i32 = arith.constant 0 : i32
    %c0_i32_0 = arith.constant 0 : i32
    %c0_i32_1 = arith.constant 0 : i32
    return %c0_i32, %c0_i32_0 : i32, i32
  }
  func.func @transform_6(%arg0: i32) -> (i32, i32) {
    %c0_i32 = arith.constant 0 : i32
    %c0_i32_0 = arith.constant 0 : i32
    return %arg0, %c0_i32 : i32, i32
  }
}

</mosaic_0001>

<bundles_post_ra>
// kernel: tpu_custom_call.1
= control target key start
LH: loop header
LB: loop body
LE: loop exit
PB: predicated region body
PF: predicated region fallthrough
CT: control target
= control target key end

     0   :  { %11 = vsyncpa [#allocation3], 0  ;;  %s1736_s0 = inlined_call_operand.hbm [shape: bf16[16,128], index: 0, kind: input, shape index: {}]   ;;  %s1737_s1 = inlined_call_operand.hbm [shape: bf16[16,128], index: 1, kind: input, shape index: {}]   ;;  %s1738_s2 = inlined_call_operand.hbm [shape: bf16[3,128,128], index: 2, kind: input, shape index: {}]   ;;  %s1739_s3 = inlined_call_operand.hbm [shape: f32[3,1,128], index: 3, kind: input, shape index: {}]   ;;  %s1740_s4 = inlined_call_operand.hbm [shape: bf16[128,640], index: 4, kind: input, shape index: {}]   ;;  %s1741_s5 = inlined_call_operand.hbm [shape: f32[1,640], index: 5, kind: input, shape index: {}]   ;;  %s1742_s6 = inlined_call_operand.hbm [shape: f32[16,640], index: 6, kind: output, shape index: {}]  }
   0x1   :  { %12 = vsyncpa [#allocation6], 0 }
   0x2   :  { %13 = vsyncpa [#allocation9], 0 }
   0x3   :  { %14 = vsyncpa [#allocation12], 0 }
   0x4   :  { %15 = vsyncpa [#allocation4], 0  ;;  %s33_s23 = sshll.u32 %s1737_s1, 4  ;;  %s1557_s24 = smov [#allocation5]   ;;  %s34_s23 = int_to_ptr.hbm [resolvable:$true] %s33_s23 }
   0x5   :  { %s35_s25 = sshll.u32 %s1557_s24, 4  ;;  %s59_s28 = sshll.u32 %s1739_s3, 4  ;;  %s36_s25 = int_to_ptr.vmem [resolvable:$true] %s35_s25  ;;  %s60_s28 = int_to_ptr.hbm [resolvable:$true] %s59_s28 }
   0x6   :  { %s1558_s29 = smov 64   ;;  %s1559_s30 = smov 4  }
   0x7   :  { %41 = dma.hbm_to_vmem [thread:$0]  %s34_s23, 128, %s36_s25, [#allocation6], %s1558_s29, %s1558_s29, %s1559_s30  }
   0x8   :  { %s1560_s7 = smov [#allocation8]   ;;  %s1561_s9 = smov 16  }
   0x9   :  { %s61_s8 = sshll.u32 %s1560_s7, 4  ;;  %s1562_s10 = smov 1   ;;  %s62_s8 = int_to_ptr.vmem [resolvable:$true] %s61_s8 }
   0xa   :  { %67 = dma.hbm_to_vmem [thread:$0]  %s60_s28, 48, %s62_s8, [#allocation9], %s1561_s9, %s1561_s9, %s1562_s10  }
   0xb   :  { %s20_s12 = sshll.u32 %s1736_s0, 4  ;;  %s1563_s13 = smov [#allocation2]   ;;  %s21_s12 = int_to_ptr.hbm [resolvable:$true] %s20_s12 }
   0xc   :  { %s22_s14 = sshll.u32 %s1563_s13, 4  ;;  %s46_s16 = sshll.u32 %s1738_s2, 4  ;;  %s23_s14 = int_to_ptr.vmem [resolvable:$true] %s22_s14  ;;  %s47_s16 = int_to_ptr.hbm [resolvable:$true] %s46_s16 }
   0xd   :  { %28 = dma.hbm_to_vmem [thread:$0]  %s21_s12, 128, %s23_s14, [#allocation3], %s1558_s29, %s1558_s29, %s1559_s30  }
   0xe   :  { %s1564_s17 = smov [#allocation7]   ;;  %s72_s21 = sshll.u32 %s1740_s4, 4  ;;  %s73_s21 = int_to_ptr.hbm [resolvable:$true] %s72_s21 }
   0xf   :  { %s48_s18 = sshll.u32 %s1564_s17, 4  ;;  %s1565_s0 = smov [#allocation10]   ;;  %s49_s18 = int_to_ptr.vmem [resolvable:$true] %s48_s18 }
  0x10   :  { %54 = dma.hbm_to_vmem [thread:$0]  %s47_s16, 3072, %s49_s18, [#allocation6], %s1558_s29, %s1558_s29, %s1559_s30  }
  0x11   :  { %s74_s22 = sshll.u32 %s1565_s0, 4  ;;  %s86_s25 = sshll.u32 %s1741_s5, 4  ;;  %s75_s22 = int_to_ptr.vmem [resolvable:$true] %s74_s22  ;;  %s87_s25 = int_to_ptr.hbm [resolvable:$true] %s86_s25 }
  0x12   :  { %s1566_s26 = smov 320   ;;  %s1567_s2 = smov 20  }
  0x13   :  { %80 = dma.hbm_to_vmem [thread:$0]  %s73_s21, 5120, %s75_s22, [#allocation9], %s1566_s26, %s1566_s26, %s1567_s2  }
  0x14   :  { %s1568_s27 = smov [#allocation11]  }
  0x15   :  { %s88_s28 = sshll.u32 %s1568_s27, 4  ;;  %s89_s28 = int_to_ptr.vmem [resolvable:$true] %s88_s28 }
  0x16   :  { %91 = dma.hbm_to_vmem [thread:$0]  %s87_s25, 80, %s89_s28, [#allocation12]  }
  0x17   :  { %1547 = dma.done.wait [#allocation3], 128  }
  0x18   :  { %1548 = vsyncadd [#allocation3], 4294967168 }
  0x19   :  { %1549 = dma.done.wait [#allocation6], 3200  }
  0x1a   :  { %1550 = vsyncadd [#allocation6], 4294964096 }
  0x1b   :  { %1551 = dma.done.wait [#allocation9], 5168  }
  0x1c   :  { %1552 = vsyncadd [#allocation9], 4294962128 }
  0x1d   :  { %1553 = dma.done.wait [#allocation12], 80  }
  0x1e   :  { %1554 = vsyncadd [#allocation12], 4294967216  ;;  %v1260_v0 = vld [vmem:[#allocation7 + $0x38] sm:$0xff]  ;;  %v1259_v1 = vld [vmem:[#allocation7 + $0x30] sm:$0xff]  ;;  %s1569_s4 = smov [#allocation13]   ;;  %s976_s7 = sshll.u32 %s1742_s6, 4  ;;  %s977_s7 = int_to_ptr.hbm [resolvable:$true] %s976_s7 }
  0x1f   :  { %192 = vmatpush.bf16.msra.mxu0 %v1260_v0  ;;  %v1268_v2 = vld [vmem:[#allocation7 + $0x78] sm:$0xff]  ;;  %v1267_v3 = vld [vmem:[#allocation7 + $0x70] sm:$0xff]  ;;  %v1258_v4 = vld [vmem:[#allocation7 + $0x28] sm:$0xff]  ;;  %s974_s5 = sshll.u32 %s1569_s4, 4  ;;  %s1570_s8 = smov 640   ;;  %s975_s5 = int_to_ptr.vmem [resolvable:$true] %s974_s5 }
  0x20   :  { %285 = vmatpush.bf16.msra.mxu1 %v1268_v2  ;;  %v1266_v5 = vld [vmem:[#allocation7 + $0x68] sm:$0xff]  ;;  %v1257_v6 = vld [vmem:[#allocation7 + $0x20] sm:$0xff]  ;;  %v1256_v8 = vld [vmem:[#allocation7 + $0x18] sm:$0xff]  ;;  %s1571_s9 = smov 40  }
  0x21   :  { %v1265_v7 = vld [vmem:[#allocation7 + $0x60] sm:$0xff]  ;;  %v1255_v9 = vld [vmem:[#allocation7 + $0x10] sm:$0xff]  ;;  %v1254_v10 = vld [vmem:[#allocation7 + $0x8] sm:$0xff] }
  0x22   :  { %v1253_v11 = vld [vmem:[#allocation7] sm:$0xff]  ;;  %v1252_v12 = vld [vmem:[#allocation2] sm:$0xff]  ;;  %v1264_v13 = vld [vmem:[#allocation7 + $0x58] sm:$0xff] }
  0x23   :  { %193 = vmatpush.bf16.msra.mxu0 %v1259_v1  ;;  %v1263_v14 = vld [vmem:[#allocation7 + $0x50] sm:$0xff]  ;;  %v1262_v15 = vld [vmem:[#allocation7 + $0x48] sm:$0xff]  ;;  %v1261_v16 = vld [vmem:[#allocation7 + $0x40] sm:$0xff] }
  0x24   :  { %286 = vmatpush.bf16.msra.mxu1 %v1267_v3  ;;  %v1276_v17 = vld [vmem:[#allocation7 + $0xb8] sm:$0xff]  ;;  %v1275_v18 = vld [vmem:[#allocation7 + $0xb0] sm:$0xff]  ;;  %v1274_v19 = vld [vmem:[#allocation7 + $0xa8] sm:$0xff] }
  0x25   :  { %372 = vmatpush.bf16.msra.mxu2 %v1276_v17  ;;  %v1273_v20 = vld [vmem:[#allocation7 + $0xa0] sm:$0xff]  ;;  %v1318_v24 = vld [vmem:[#allocation5] sm:$0xff]   ;;  %v1271_v35 = vld [vmem:[#allocation7 + $0x90] sm:$0xff] }
  0x26   :  { %v1336_v22 = vld [vmem:[#allocation8] ss:$0 sm:$0xff]  ;;  %v1319_v27 = vunpack.c.l.bf16 %v1318_v24  ;;  %v1320_v29 = vunpack.c.h.bf16 %v1318_v24  ;;  %v1272_v34 = vld [vmem:[#allocation7 + $0x98] sm:$0xff]  ;;  %v1270_v36 = vld [vmem:[#allocation7 + $0x88] sm:$0xff] }
  0x27   :  { %194 = vmatpush.bf16.msra.mxu0 %v1258_v4  ;;  %v1269_v37 = vld [vmem:[#allocation7 + $0x80] sm:$0xff]  ;;  %v1234_v38 = vld [vmem:[#allocation10 + $0x118] sm:$0xf]  ;;  %v1314_v39 = vld [vmem:[#allocation10 + $0x128] sm:$0xf0] }
  0x28   :  { %287 = vmatpush.bf16.msra.mxu1 %v1266_v5  ;;  %v1214_v40 = vld [vmem:[#allocation10 + $0xf0] sm:$0xf]  ;;  %v1235_v41 = vor.u32 %v1314_v39, %v1234_v38  ;;  %v1309_v42 = vld [vmem:[#allocation10 + $0x100] sm:$0xf0]  ;;  %v1194_v43 = vld [vmem:[#allocation10 + $0xc8] sm:$0xf] }
  0x29   :  { %373 = vmatpush.bf16.msra.mxu2 %v1275_v18  ;;  %v1312_v44 = vld [vmem:[#allocation10 + $0x11c] sm:$0xf]  ;;  %v1215_v45 = vor.u32 %v1309_v42, %v1214_v40  ;;  %v1236_v46 = vld [vmem:[#allocation10 + $0x12c] sm:$0xf0]  ;;  %v1242_v47 = vld [vmem:[#allocation10 + $0x120] sm:$0xf] }
  0x2a   :  { %657 = vmatpush.bf16.msra.mxu3 %v1235_v41  ;;  %v1315_v48 = vld [vmem:[#allocation10 + $0x130] sm:$0xf0]  ;;  %v1304_v49 = vld [vmem:[#allocation10 + $0xd8] sm:$0xf0]  ;;  %v1239_v50 = vor.u32 %v1312_v44, %v1236_v46  ;;  %v1313_v52 = vld [vmem:[#allocation10 + $0x124] sm:$0xf] }
  0x2b   :  { %195 = vmatpush.bf16.msra.mxu0 %v1257_v6  ;;  %v1243_v51 = vor.u32 %v1315_v48, %v1242_v47  ;;  %v1244_v53 = vld [vmem:[#allocation10 + $0x134] sm:$0xf0]  ;;  %v1307_v55 = vld [vmem:[#allocation10 + $0xf4] sm:$0xf]  ;;  %v1216_v56 = vld [vmem:[#allocation10 + $0x104] sm:$0xf0]  ;;  %v1195_v61 = vor.u32 %v1304_v49, %v1194_v43 }
  0x2c   :  { %288 = vmatpush.bf16.msra.mxu1 %v1265_v7  ;;  %v1247_v54 = vor.u32 %v1313_v52, %v1244_v53  ;;  %v1219_v57 = vor.u32 %v1307_v55, %v1216_v56  ;;  %v1222_v58 = vld [vmem:[#allocation10 + $0xf8] sm:$0xf]  ;;  %v1310_v59 = vld [vmem:[#allocation10 + $0x108] sm:$0xf0]  ;;  %v1308_v60 = vld [vmem:[#allocation10 + $0xfc] sm:$0xf] }
  0x2d   :  { %374 = vmatpush.bf16.msra.mxu2 %v1274_v19  ;;  %v1174_v62 = vld [vmem:[#allocation10 + $0xa0] sm:$0xf]  ;;  %v1299_v63 = vld [vmem:[#allocation10 + $0xb0] sm:$0xf0]  ;;  %v1223_v0 = vor.u32 %v1310_v59, %v1222_v58  ;;  %v1224_v1 = vld [vmem:[#allocation10 + $0x10c] sm:$0xf0] }
  0x2e   :  { %658 = vmatpush.bf16.msra.mxu3 %v1215_v45  ;;  %v1227_v2 = vor.u32 %v1308_v60, %v1224_v1  ;;  %v1302_v3 = vld [vmem:[#allocation10 + $0xcc] sm:$0xf]  ;;  %v1196_v4 = vld [vmem:[#allocation10 + $0xdc] sm:$0xf0]  ;;  %v1202_v5 = vld [vmem:[#allocation10 + $0xd0] sm:$0xf] }
  0x2f   :  { %196 = vmatpush.bf16.msra.mxu0 %v1256_v8  ;;  %v1305_v6 = vld [vmem:[#allocation10 + $0xe0] sm:$0xf0]  ;;  %v1303_v7 = vld [vmem:[#allocation10 + $0xd4] sm:$0xf]  ;;  %v1204_v8 = vld [vmem:[#allocation10 + $0xe4] sm:$0xf0] }
  0x30   :  { %289 = vmatpush.bf16.msra.mxu1 %v1264_v13  ;;  %v1175_v13 = vor.u32 %v1299_v63, %v1174_v62  ;;  %v1300_v17 = vld [vmem:[#allocation10 + $0xb8] sm:$0xf0]  ;;  %v1294_v18 = vld [vmem:[#allocation10 + $0x88] sm:$0xf0]  ;;  %v1156_v43 = vld [vmem:[#allocation10 + $0x8c] sm:$0xf0] }
  0x31   :  { %375 = vmatpush.bf16.msra.mxu2 %v1273_v20  ;;  %v1298_v19 = vld [vmem:[#allocation10 + $0xac] sm:$0xf]  ;;  %v1184_v20 = vld [vmem:[#allocation10 + $0xbc] sm:$0xf0]  ;;  %v1292_v42 = vld [vmem:[#allocation10 + $0x7c] sm:$0xf] }
  0x32   :  { %659 = vmatpush.bf16.msra.mxu3 %v1195_v61  ;;  %v1187_v24 = vor.u32 %v1298_v19, %v1184_v20  ;;  %v1162_v44 = vld [vmem:[#allocation10 + $0x80] sm:$0xf]  ;;  %v1159_v45 = vor.u32 %v1292_v42, %v1156_v43  ;;  %v1295_v46 = vld [vmem:[#allocation10 + $0x90] sm:$0xf0]  ;;  %v1293_v47 = vld [vmem:[#allocation10 + $0x84] sm:$0xf] }
  0x33   :  { %197 = vmatpush.bf16.msra.mxu0 %v1255_v9  ;;  %v1154_v9 = vld [vmem:[#allocation10 + $0x78] sm:$0xf]  ;;  %v1163_v49 = vor.u32 %v1295_v46, %v1162_v44  ;;  %v1316_v52 = vld [vmem:[#allocation10 + $0x138] sm:$0xf0]  ;;  %v1136_v55 = vld [vmem:[#allocation10 + $0x64] sm:$0xf0]  ;;  %v727_v46 = vlaneseq }
  0x34   :  { %290 = vmatpush.bf16.msra.mxu1 %v1263_v14  ;;  %v1207_v14 = vor.u32 %v1303_v7, %v1204_v8  ;;  %v1164_v48 = vld [vmem:[#allocation10 + $0x94] sm:$0xf0]  ;;  %v1290_v58 = vld [vmem:[#allocation10 + $0x68] sm:$0xf0]  ;;  %v1288_v59 = vld [vmem:[#allocation10 + $0x5c] sm:$0xf] }
  0x35   :  { %376 = vmatpush.bf16.msra.mxu2 %v1272_v34  ;;  %v1094_v34 = vld [vmem:[#allocation10] sm:$0xf]  ;;  %v1142_v56 = vld [vmem:[#allocation10 + $0x58] sm:$0xf]  ;;  %v1144_v60 = vld [vmem:[#allocation10 + $0x6c] sm:$0xf0] }
  0x36   :  { %660 = vmatpush.bf16.msra.mxu3 %v1175_v13  ;;  %v1143_v61 = vor.u32 %v1290_v58, %v1142_v56  ;;  %v1147_v62 = vor.u32 %v1288_v59, %v1144_v60  ;;  %v1230_v63 = vld [vmem:[#allocation10 + $0x100] sm:$0xf]  ;;  %v1283_v7 = vld [vmem:[#allocation10 + $0x34] sm:$0xf]  ;;  %v1124_v8 = vld [vmem:[#allocation10 + $0x44] sm:$0xf0] }
  0x37   :  { %198 = vmatpush.bf16.msra.mxu0 %v1254_v10  ;;  %v1199_v10 = vor.u32 %v1302_v3, %v1196_v4  ;;  %v1116_v3 = vld [vmem:[#allocation10 + $0x3c] sm:$0xf0]  ;;  %v1122_v4 = vld [vmem:[#allocation10 + $0x30] sm:$0xf]  ;;  %v1278_v19 = vld [vmem:[#allocation10 + $0xc] sm:$0xf] }
  0x38   :  { %291 = vmatpush.bf16.msra.mxu1 %v1262_v15  ;;  %v1176_v15 = vld [vmem:[#allocation10 + $0xb4] sm:$0xf0]  ;;  %v1104_v20 = vld [vmem:[#allocation10 + $0x1c] sm:$0xf0] }
  0x39   :  { %377 = vmatpush.bf16.msra.mxu2 %v1271_v35  ;;  %v1279_v35 = vld [vmem:[#allocation10 + $0x10] sm:$0xf0] }
  0x3a   :  { %v1095_v38 = vor.u32 %v1279_v35, %v1094_v34  ;;  %v1110_v35 = vld [vmem:[#allocation10 + $0x10] sm:$0xf] }
  0x3b   :  { %199 = vmatpush.bf16.msra.mxu0 %v1253_v11  ;;  %v1203_v11 = vor.u32 %v1305_v6, %v1202_v5  ;;  %v1285_v6 = vld [vmem:[#allocation10 + $0x40] sm:$0xf0] }
  0x3c   :  { %292 = vmatpush.bf16.msra.mxu1 %v1261_v16  ;;  %v1182_v16 = vld [vmem:[#allocation10 + $0xa8] sm:$0xf] }
  0x3d   :  { %378 = vmatpush.bf16.msra.mxu2 %v1270_v36 }
  0x3e   :  { %200 = vmatmul.bf16.vlgmr.msra.gmra.mxu0 %v1252_v12  ;;  %v1297_v12 = vld [vmem:[#allocation10 + $0xa4] sm:$0xf] }
  0x3f   :  { %671 = vmatpush.bf16.msrb.mxu0 %v1239_v50  ;;  %v1167_v50 = vor.u32 %v1293_v47, %v1164_v48  ;;  %v437_v47 = vld [vmem:[#allocation11] sm:$0x1f]  ;;  %v728_v48 = vand.u32 127, %v727_v46 }
  0x40   :  { %685 = vmatpush.bf16.msrb.mxu1 %v1243_v51  ;;  %v1250_v51 = vld [vmem:[#allocation10 + $0x128] sm:$0xf]  ;;  %v439_v56 = vperm.slane %v437_v47, 0 }
  0x41   :  { %379 = vmatpush.bf16.msra.mxu2 %v1269_v37  ;;  %v1251_v53 = vor.u32 %v1316_v52, %v1250_v51  ;;  %vm729_vm0 = vcmp.lt.s32.totalorder %v728_v48, 11 }
  0x43   :  { %672 = vmatpush.bf16.msrb.mxu0 %v1219_v57 }
  0x44   :  { %686 = vmatpush.bf16.msrb.mxu1 %v1223_v0  ;;  %v1311_v0 = vld [vmem:[#allocation10 + $0x110] sm:$0xf0] }
  0x45   :  { %699 = vmatpush.bf16.msrb.mxu2 %v1247_v54  ;;  %v1287_v54 = vld [vmem:[#allocation10 + $0x54] sm:$0xf]  ;;  %v1231_v1 = vor.u32 %v1311_v0, %v1230_v63 }
  0x46   :  { %v1139_v57 = vor.u32 %v1287_v54, %v1136_v55 }
  0x47   :  { %673 = vmatpush.bf16.msrb.mxu0 %v1199_v10  ;;  %v1127_v10 = vor.u32 %v1283_v7, %v1124_v8 }
  0x48   :  { %687 = vmatpush.bf16.msrb.mxu1 %v1203_v11  ;;  %v1210_v11 = vld [vmem:[#allocation10 + $0xd8] sm:$0xf] }
  0x49   :  { %700 = vmatpush.bf16.msrb.mxu2 %v1227_v2  ;;  %v1282_v2 = vld [vmem:[#allocation10 + $0x2c] sm:$0xf] }
  0x4a   :  { %v1119_v5 = vor.u32 %v1282_v2, %v1116_v3 }
  0x4d   :  { %701 = vmatpush.bf16.msrb.mxu2 %v1207_v14  ;;  %v1277_v14 = vld [vmem:[#allocation10 + $0x4] sm:$0xf] }
  0x51   :  { %702 = vmatpush.bf16.msrb.mxu2 %v1187_v24  ;;  %v1301_v24 = vld [vmem:[#allocation10 + $0xc0] sm:$0xf0] }
  0x55   :  { %703 = vmatpush.bf16.msrb.mxu2 %v1167_v50  ;;  %v441_v50 = vperm.slane %v437_v47, 2 }
  0x59   :  { %704 = vmatpush.bf16.msrb.mxu2 %v1147_v62  ;;  %v442_v62 = vperm.slane %v437_v47, 3 }
  0x5d   :  { %705 = vmatpush.bf16.msrb.mxu2 %v1127_v10 }
  0xbb   :  { %v201_v21 = vpop.f32.mrf.mxu0 }
  0xbc   :  { %v202_v23 = vadd.f32 %v1336_v22, %v201_v21  ;;  %v1179_v21 = vor.u32 %v1297_v12, %v1176_v15  ;;  %v1306_v12 = vld [vmem:[#allocation10 + $0xe8] sm:$0xf0]  ;;  %v1096_v15 = vld [vmem:[#allocation10 + $0x14] sm:$0xf0] }
  0xbd   :  { %v1211_v13 = vor.u32 %v1306_v12, %v1210_v11  ;;  %v443_v11 = vperm.slane %v437_v47, 4 }
  0xbe   :  { %v206_v26 = vmax.f32 %v202_v23, 0.0  ;;  %v1155_v23 = vor.u32 %v1294_v18, %v1154_v9  ;;  %674 = vmatpush.bf16.msrb.mxu0 %v1179_v21  ;;  %v1123_v9 = vor.u32 %v1285_v6, %v1122_v4  ;;  %v1280_v18 = vld [vmem:[#allocation10 + $0x18] sm:$0xf0] }
  0xc0   :  { %v212_v31 = vmul.f32 %v1319_v27, %v206_v26  ;;  %v1289_v26 = vld [vmem:[#allocation10 + $0x60] sm:$0xf0]  ;;  %661 = vmatpush.bf16.msra.mxu3 %v1155_v23  ;;  %v1190_v23 = vld [vmem:[#allocation10 + $0xb0] sm:$0xf] }
  0xc2   :  { %675 = vmatpush.bf16.msrb.mxu0 %v1159_v45 }
  0xc3   :  { %v203_v25 = vpop.f32.mrf.mxu0 }
  0xc4   :  { %v204_v28 = vadd.f32 %v1336_v22, %v203_v25  ;;  %v1183_v22 = vor.u32 %v1300_v17, %v1182_v16  ;;  %v1134_v25 = vld [vmem:[#allocation10 + $0x50] sm:$0xf]  ;;  %v1102_v16 = vld [vmem:[#allocation10 + $0x8] sm:$0xf]  ;;  %v1099_v17 = vor.u32 %v1277_v14, %v1096_v15 }
  0xc5   :  { %v1103_v21 = vor.u32 %v1280_v18, %v1102_v16 }
  0xc6   :  { %v207_v30 = vmax.f32 %v204_v28, 0.0  ;;  %688 = vmatpush.bf16.msrb.mxu1 %v1183_v22  ;;  %v1135_v28 = vor.u32 %v1289_v26, %v1134_v25  ;;  %676 = vmatpush.bf16.msrb.mxu0 %v1139_v57  ;;  %v1107_v22 = vor.u32 %v1278_v19, %v1104_v20  ;;  %v1191_v25 = vor.u32 %v1301_v24, %v1190_v23  ;;  %v1170_v26 = vld [vmem:[#allocation10 + $0x88] sm:$0xf] }
  0xc8   :  { %v213_v32 = vmul.f32 %v1320_v29, %v207_v30  ;;  %v1337_v29 = vld [vmem:[#allocation8 + $0x1] ss:$0 sm:$0xff]  ;;  %v1114_v30 = vld [vmem:[#allocation10 + $0x28] sm:$0xf]  ;;  %662 = vmatpush.bf16.msra.mxu3 %v1135_v28  ;;  %706 = vmatpush.bf16.msrb.mxu2 %v1107_v22 }
  0xca   :  { %v214_v33 = vpack.c.bf16 %v213_v32, %v212_v31  ;;  %v1284_v31 = vld [vmem:[#allocation10 + $0x38] sm:$0xf0]  ;;  %689 = vmatpush.bf16.msrb.mxu1 %v1163_v49  ;;  %677 = vmatpush.bf16.msrb.mxu0 %v1119_v5  ;;  %v440_v49 = vperm.slane %v437_v47, 1 }
  0xcb   :  { %v1115_v32 = vor.u32 %v1284_v31, %v1114_v30  ;;  %v1291_v30 = vld [vmem:[#allocation10 + $0x70] sm:$0xf0] }
  0xcc   :  { %293 = vmatmul.bf16.vlgmr.msra.gmra.mxu1 %v214_v33 }
  0xcd   :  { %663 = vmatpush.bf16.msra.mxu3 %v1115_v32  ;;  %v1130_v32 = vld [vmem:[#allocation10 + $0x38] sm:$0xf] }
  0xce   :  { %690 = vmatpush.bf16.msrb.mxu1 %v1143_v61  ;;  %678 = vmatpush.bf16.msrb.mxu0 %v1099_v17 }
  0xd1   :  { %664 = vmatpush.bf16.msra.mxu3 %v1095_v38 }
  0xd2   :  { %691 = vmatpush.bf16.msrb.mxu1 %v1123_v9 }
  0xd5   :  { %713 = vmatpush.bf16.msrb.mxu3 %v1251_v53 }
  0xd6   :  { %692 = vmatpush.bf16.msrb.mxu1 %v1103_v21 }
  0xd9   :  { %714 = vmatpush.bf16.msrb.mxu3 %v1231_v1 }
  0xdd   :  { %715 = vmatpush.bf16.msrb.mxu3 %v1211_v13 }
  0xe1   :  { %716 = vmatpush.bf16.msrb.mxu3 %v1191_v25 }
 0x149   :  { %v294_v27 = vpop.f32.mrf.mxu1 }
 0x14a   :  { %v295_v33 = vadd.f32 %v1337_v29, %v294_v27  ;;  %v1296_v27 = vld [vmem:[#allocation10 + $0x98] sm:$0xf0] }
 0x14b   :  { %v1171_v28 = vor.u32 %v1296_v27, %v1170_v26 }
 0x14c   :  { %v299_v39 = vmax.f32 %v295_v33, 0.0  ;;  %v1286_v33 = vld [vmem:[#allocation10 + $0x48] sm:$0xf0] }
 0x14d   :  { %717 = vmatpush.bf16.msrb.mxu3 %v1171_v28  ;;  %v1131_v34 = vor.u32 %v1286_v33, %v1130_v32 }
 0x151   :  { %v296_v36 = vpop.f32.mrf.mxu1 }
 0x152   :  { %v297_v37 = vadd.f32 %v1337_v29, %v296_v36  ;;  %v1150_v29 = vld [vmem:[#allocation10 + $0x60] sm:$0xf]  ;;  %v1281_v36 = vld [vmem:[#allocation10 + $0x20] sm:$0xf0] }
 0x153   :  { %v1151_v31 = vor.u32 %v1291_v30, %v1150_v29 }
 0x154   :  { %v300_v40 = vmax.f32 %v297_v37, 0.0  ;;  %v1111_v37 = vor.u32 %v1281_v36, %v1110_v35 }
 0x155   :  { %718 = vmatpush.bf16.msrb.mxu3 %v1151_v31 }
 0x156   :  { %v301_v41 = vpack.c.bf16 %v300_v40, %v299_v39  ;;  %v1338_v39 = vld [vmem:[#allocation8 + $0x2] ss:$0 sm:$0xff] }
 0x158   :  { %380 = vmatmul.bf16.vlgmr.msra.gmra.mxu2 %v301_v41 }
 0x159   :  { %719 = vmatpush.bf16.msrb.mxu3 %v1131_v34 }
 0x15d   :  { %720 = vmatpush.bf16.msrb.mxu3 %v1111_v37 }
 0x1db   :  { %v381_v38 = vpop.f32.mrf.mxu2 }
 0x1dc   :  { %v382_v40 = vadd.f32 %v1338_v39, %v381_v38 }
 0x1de   :  { %v386_v43 = vmax.f32 %v382_v40, 0.0 }
 0x1e3   :  { %v383_v41 = vpop.f32.mrf.mxu2 }
 0x1e4   :  { %v384_v42 = vadd.f32 %v1338_v39, %v383_v41 }
 0x1e6   :  { %v387_v44 = vmax.f32 %v384_v42, 0.0 }
 0x1e8   :  { %v388_v45 = vpack.c.bf16 %v387_v44, %v386_v43 }
 0x1ea   :  { %665 = vmatmul.bf16.vlgmr.msra.gmra.mxu3 %v388_v45  ;;  %679 = vmatmul.bf16.vlgmr.msrb.gmra.mxu0 %v388_v45 }
 0x1eb   :  { %693 = vmatmul.bf16.vlgmr.msrb.gmra.mxu1 %v388_v45  ;;  %707 = vmatmul.bf16.vlgmr.msrb.gmra.mxu2 %v388_v45 }
 0x1fa   :  { %721 = vmatmul.bf16.vlgmr.msrb.gmra.mxu3 %v388_v45 }
 0x267   :  { %v680_v51 = vpop.f32.mrf.mxu0 }
 0x268   :  { %v681_v52 = vadd.f32 %v680_v51, %v440_v49  ;;  %v694_v53 = vpop.f32.mrf.mxu1 }
 0x269   :  { %v695_v54 = vadd.f32 %v694_v53, %v441_v50 }
 0x26a   :  { %v778_v55 = vsel %vm729_vm0, %v681_v52, -1e+30 }
 0x26b   :  { %v826_v57 = vsel %vm729_vm0, %v695_v54, -1e+30  ;;  %780 = vmax.xlane.f32.xlu1 %v778_v55 }
 0x26c   :  { %828 = vmax.xlane.f32.xlu2 %v826_v57 }
 0x26d   :  { %v666_v58 = vpop.f32.mrf.mxu3 }
 0x26e   :  { %v667_v59 = vadd.f32 %v666_v58, %v439_v56  ;;  %v708_v60 = vpop.f32.mrf.mxu2 }
 0x26f   :  { %v682_v61 = vpop.f32.mrf.mxu0  ;;  %v709_v5 = vadd.f32 %v708_v60, %v442_v62 }
 0x270   :  { %v683_v63 = vadd.f32 %v682_v61, %v440_v49  ;;  %v696_v0 = vpop.f32.mrf.mxu1  ;;  %v730_v1 = vsel %vm729_vm0, %v667_v59, -1e+30 }
 0x271   :  { %v697_v2 = vadd.f32 %v696_v0, %v441_v50  ;;  %732 = vmax.xlane.f32.xlu0 %v730_v1  ;;  %v874_v9 = vsel %vm729_vm0, %v709_v5, -1e+30 }
 0x272   :  { %v779_v3 = vsel %vm729_vm0, %v683_v63, -1e+30 }
 0x273   :  { %v827_v4 = vsel %vm729_vm0, %v697_v2, -1e+30  ;;  %782 = vmax.xlane.f32.xlu1 %v779_v3 }
 0x274   :  { %830 = vmax.xlane.f32.xlu2 %v827_v4 }
 0x275   :  { %v668_v6 = vpop.f32.mrf.mxu3 }
 0x276   :  { %v710_v7 = vpop.f32.mrf.mxu2  ;;  %v669_v12 = vadd.f32 %v668_v6, %v439_v56 }
 0x277   :  { %v711_v8 = vadd.f32 %v710_v7, %v442_v62 }
 0x278   :  { %v731_v16 = vsel %vm729_vm0, %v669_v12, -1e+30 }
 0x279   :  { %876 = vmax.xlane.f32.xlu0 %v874_v9  ;;  %v875_v10 = vsel %vm729_vm0, %v711_v8, -1e+30 }
 0x27b   :  { %878 = vmax.xlane.f32.xlu1 %v875_v10 }
 0x27d   :  { %v722_v13 = vpop.f32.mrf.mxu3 }
 0x27e   :  { %v723_v14 = vadd.f32 %v722_v13, %v443_v11 }
 0x280   :  { %v922_v15 = vsel %vm729_vm0, %v723_v14, -1e+30 }
 0x281   :  { %924 = vmax.xlane.f32.xlu2 %v922_v15  ;;  %734 = vmax.xlane.f32.xlu0 %v731_v16 }
 0x285   :  { %v724_v17 = vpop.f32.mrf.mxu3 }
 0x286   :  { %v725_v18 = vadd.f32 %v724_v17, %v443_v11 }
 0x288   :  { %v923_v19 = vsel %vm729_vm0, %v725_v18, -1e+30 }
 0x289   :  { %926 = vmax.xlane.f32.xlu0 %v923_v19 }
 0x2de   :  { %v781_v20 = vpop.xlane.xlu1 %780 }
 0x2df   :  { %v829_v21 = vpop.xlane.xlu2 %828  ;;  %v784_v22 = vsub.f32 %v778_v55, %v781_v20 }
 0x2e0   :  { %v832_v23 = vsub.f32 %v826_v57, %v829_v21 }
 0x2e1   :  { %v786_v24 = vmul.f32 1.442695, %v784_v22 }
 0x2e2   :  { %v834_v25 = vmul.f32 1.442695, %v832_v23 }
 0x2e3   :  { %1339 = vpow2.f32 %v786_v24 }
 0x2e4   :  { %1341 = vpow2.f32 %v834_v25  ;;  %v733_v26 = vpop.xlane.xlu0 %732 }
 0x2e5   :  { %v736_v27 = vsub.f32 %v730_v1, %v733_v26 }
 0x2e6   :  { %v783_v35 = vpop.xlane.xlu1 %782 }
 0x2e7   :  { %v738_v28 = vmul.f32 1.442695, %v736_v27  ;;  %v831_v29 = vpop.xlane.xlu2 %830  ;;  %v785_v39 = vsub.f32 %v779_v3, %v783_v35 }
 0x2e8   :  { %v833_v30 = vsub.f32 %v827_v4, %v831_v29 }
 0x2e9   :  { %v1635_v31 = vpop.eup %1339  ;;  %1343 = vpow2.f32 %v738_v28  ;;  %v788_v41 = vmul.f32 1.442695, %v785_v39 }
 0x2ea   :  { %v1637_v32 = vpop.eup %1341  ;;  %v836_v33 = vmul.f32 1.442695, %v833_v30  ;;  %790 = vadd.xlane.f32.xlu0 %v1635_v31 }
 0x2eb   :  { %838 = vadd.xlane.f32.xlu2 %v1637_v32 }
 0x2ec   :  { %1345 = vpow2.f32 %v836_v33  ;;  %v877_v34 = vpop.xlane.xlu0 %876 }
 0x2ed   :  { %v880_v36 = vsub.f32 %v874_v9, %v877_v34 }
 0x2ee   :  { %v879_v47 = vpop.xlane.xlu1 %878 }
 0x2ef   :  { %v1641_v37 = vpop.eup %1343  ;;  %v882_v38 = vmul.f32 1.442695, %v880_v36  ;;  %v881_v50 = vsub.f32 %v875_v10, %v879_v47 }
 0x2f0   :  { %742 = vadd.xlane.f32.xlu1 %v1641_v37 }
 0x2f1   :  { %1347 = vpow2.f32 %v882_v38  ;;  %v884_v54 = vmul.f32 1.442695, %v881_v50 }
 0x2f2   :  { %v1644_v40 = vpop.eup %1345  ;;  %1349 = vpow2.f32 %v788_v41 }
 0x2f3   :  { %840 = vadd.xlane.f32.xlu0 %v1644_v40 }
 0x2f4   :  { %v925_v42 = vpop.xlane.xlu2 %924  ;;  %v735_v43 = vpop.xlane.xlu0 %734 }
 0x2f5   :  { %v928_v44 = vsub.f32 %v922_v15, %v925_v42  ;;  %v737_v45 = vsub.f32 %v731_v16, %v735_v43 }
 0x2f7   :  { %v1647_v46 = vpop.eup %1347  ;;  %v930_v48 = vmul.f32 1.442695, %v928_v44  ;;  %v740_v49 = vmul.f32 1.442695, %v737_v45 }
 0x2f8   :  { %886 = vadd.xlane.f32.xlu1 %v1647_v46  ;;  %v1650_v53 = vpop.eup %1349 }
 0x2f9   :  { %1351 = vpow2.f32 %v930_v48 }
 0x2fa   :  { %1353 = vpow2.f32 %v740_v49 }
 0x2fc   :  { %v927_v51 = vpop.xlane.xlu0 %926 }
 0x2fd   :  { %v929_v52 = vsub.f32 %v923_v19, %v927_v51 }
 0x2ff   :  { %v1652_v55 = vpop.eup %1351  ;;  %v932_v56 = vmul.f32 1.442695, %v929_v52 }
 0x300   :  { %v1654_v57 = vpop.eup %1353  ;;  %934 = vadd.xlane.f32.xlu0 %v1652_v55  ;;  %792 = vadd.xlane.f32.xlu1 %v1650_v53 }
 0x301   :  { %1355 = vpow2.f32 %v932_v56  ;;  %744 = vadd.xlane.f32.xlu2 %v1654_v57 }
 0x302   :  { %1357 = vpow2.f32 %v884_v54 }
 0x307   :  { %v1659_v58 = vpop.eup %1355 }
 0x308   :  { %v1661_v59 = vpop.eup %1357  ;;  %936 = vadd.xlane.f32.xlu1 %v1659_v58 }
 0x309   :  { %888 = vadd.xlane.f32.xlu2 %v1661_v59 }
 0x35d   :  { %v791_v60 = vpop.xlane.xlu0 %790 }
 0x35e   :  { %v839_v61 = vpop.xlane.xlu2 %838  ;;  %1359 = vrcp.f32 %v791_v60  ;;  %v803_v5 = vand.u32 2147483647, %v791_v60  ;;  %v805_v8 = vand.u32 2147483648, %v791_v60  ;;  %vm799_vm3 = vweird.f32 %v791_v60 }
 0x35f   :  { %1361 = vrcp.f32 %v839_v61  ;;  %v851_v7 = vand.u32 2147483647, %v839_v61  ;;  %v853_v9 = vand.u32 2147483648, %v839_v61  ;;  %vm847_vm4 = vweird.f32 %v839_v61 }
 0x360   :  { %vm804_vm5 = vcmp.eq.f32.partialorder %v803_v5, 8.507059e+37  ;;  %v806_v17 = vor.u32 1.1754944e-38, %v805_v8 }
 0x361   :  { %vm852_vm6 = vcmp.eq.f32.partialorder %v851_v7, 8.507059e+37  ;;  %v854_v19 = vor.u32 1.1754944e-38, %v853_v9 }
 0x363   :  { %v743_v62 = vpop.xlane.xlu1 %742 }
 0x364   :  { %v1360_v63 = vpop.eup %1359  ;;  %1363 = vrcp.f32 %v743_v62  ;;  %v755_v22 = vand.u32 2147483647, %v743_v62  ;;  %v757_v25 = vand.u32 2147483648, %v743_v62  ;;  %vm751_vm10 = vweird.f32 %v743_v62 }
 0x365   :  { %v1362_v0 = vpop.eup %1361  ;;  %v795_v1 = vmul.f32 %v1360_v63, %v791_v60  ;;  %vm800_vm1 = vweird.f32 %v1360_v63 }
 0x366   :  { %v843_v2 = vmul.f32 %v1362_v0, %v839_v61  ;;  %v1665_v3 = vpop.xlane.xlu0 %840  ;;  %vm848_vm2 = vweird.f32 %v1362_v0  ;;  %vm801_vm7 = vmor %vm799_vm3, %vm800_vm1  ;;  %v758_v38 = vor.u32 1.1754944e-38, %v757_v25  ;;  %vm756_vm13 = vcmp.eq.f32.partialorder %v755_v22, 8.507059e+37 }
 0x367   :  { %v796_v4 = vsub.f32 1.0, %v795_v1  ;;  %1365 = vrcp.f32 %v1665_v3  ;;  %vm849_vm8 = vmor %vm847_vm4, %vm848_vm2  ;;  %v868_v35 = vand.u32 2147483648, %v1665_v3  ;;  %v866_v41 = vand.u32 2147483647, %v1665_v3 }
 0x368   :  { %v844_v6 = vsub.f32 1.0, %v843_v2  ;;  %vm862_vm14 = vweird.f32 %v1665_v3 }
 0x369   :  { %v797_v10 = vmul.f32 %v1360_v63, %v796_v4  ;;  %v869_v48 = vor.u32 1.1754944e-38, %v868_v35  ;;  %vm867_vm0 = vcmp.eq.f32.partialorder %v866_v41, 8.507059e+37 }
 0x36a   :  { %v1364_v11 = vpop.eup %1363  ;;  %v845_v12 = vmul.f32 %v1362_v0, %v844_v6 }
 0x36b   :  { %v798_v13 = vadd.f32 %v1360_v63, %v797_v10  ;;  %v747_v14 = vmul.f32 %v1364_v11, %v743_v62  ;;  %v1668_v15 = vpop.xlane.xlu1 %886  ;;  %vm752_vm9 = vweird.f32 %v1364_v11 }
 0x36c   :  { %v846_v16 = vadd.f32 %v1362_v0, %v845_v12  ;;  %1367 = vrcp.f32 %v1668_v15  ;;  %vm753_vm11 = vmor %vm751_vm10, %vm752_vm9  ;;  %v901_v52 = vand.u32 2147483648, %v1668_v15  ;;  %v899_v60 = vand.u32 2147483647, %v1668_v15 }
 0x36d   :  { %v1366_v18 = vpop.eup %1365  ;;  %v802_v20 = vsel %vm801_vm7, %v1360_v63, %v798_v13  ;;  %v748_v21 = vsub.f32 1.0, %v747_v14  ;;  %vm895_vm2 = vweird.f32 %v1668_v15 }
 0x36e   :  { %v850_v23 = vsel %vm849_vm8, %v1362_v0, %v846_v16  ;;  %v807_v24 = vsel %vm804_vm5, %v806_v17, %v802_v20  ;;  %v858_v26 = vmul.f32 %v1366_v18, %v1665_v3  ;;  %vm863_vm12 = vweird.f32 %v1366_v18 }
 0x36f   :  { %v855_v27 = vsel %vm852_vm6, %v854_v19, %v850_v23  ;;  %v808_v28 = vmul.f32 %v1635_v31, %v807_v24  ;;  %v749_v29 = vmul.f32 %v1364_v11, %v748_v21  ;;  %vm864_vm15 = vmor %vm862_vm14, %vm863_vm12  ;;  %v902_v63 = vor.u32 1.1754944e-38, %v901_v52 }
 0x370   :  { %v856_v30 = vmul.f32 %v1637_v32, %v855_v27  ;;  %v859_v33 = vsub.f32 1.0, %v858_v26  ;;  %vm900_vm4 = vcmp.eq.f32.partialorder %v899_v60, 8.507059e+37 }
 0x371   :  { %824 = vst [vmem:[#allocation13 + $0x8] sm:$0xff] %v808_v28  ;;  %v750_v34 = vadd.f32 %v1364_v11, %v749_v29 }
 0x372   :  { %v1368_v36 = vpop.eup %1367  ;;  %872 = vst [vmem:[#allocation13 + $0x10] sm:$0xff] %v856_v30  ;;  %v860_v39 = vmul.f32 %v1366_v18, %v859_v33 }
 0x373   :  { %v754_v42 = vsel %vm753_vm11, %v1364_v11, %v750_v34  ;;  %v891_v31 = vmul.f32 %v1368_v36, %v1668_v15  ;;  %v793_v43 = vpop.xlane.xlu1 %792  ;;  %v1681_v50 = vpop.xlane.xlu0 %934  ;;  %vm896_vm1 = vweird.f32 %v1368_v36 }
 0x374   :  { %v759_v32 = vsel %vm756_vm13, %v758_v38, %v754_v42  ;;  %v861_v44 = vadd.f32 %v1366_v18, %v860_v39  ;;  %1369 = vrcp.f32 %v793_v43  ;;  %v1678_v45 = vpop.xlane.xlu2 %744  ;;  %vm897_vm3 = vmor %vm895_vm2, %vm896_vm1  ;;  %v818_v5 = vand.u32 2147483647, %v793_v43 }
 0x375   :  { %v760_v47 = vmul.f32 %v1641_v37, %v759_v32  ;;  %v892_v49 = vsub.f32 1.0, %v891_v31  ;;  %1371 = vrcp.f32 %v1678_v45  ;;  %vm814_vm5 = vweird.f32 %v793_v43 }
 0x376   :  { %v865_v51 = vsel %vm864_vm15, %v1366_v18, %v861_v44  ;;  %1373 = vrcp.f32 %v1681_v50  ;;  %v820_v10 = vand.u32 2147483648, %v793_v43  ;;  %v770_v11 = vand.u32 2147483647, %v1678_v45 }
 0x377   :  { %776 = vst [vmem:[#allocation13] sm:$0xff] %v760_v47  ;;  %v870_v54 = vsel %vm867_vm0, %v869_v48, %v865_v51  ;;  %v893_v56 = vmul.f32 %v1368_v36, %v892_v49  ;;  %vm1699_vm7 = vcmp.eq.f32.partialorder %v818_v5, 8.507059e+37  ;;  %vm766_vm8 = vweird.f32 %v1678_v45 }
 0x378   :  { %v871_v61 = vmul.f32 %v1644_v40, %v870_v54  ;;  %v947_v16 = vand.u32 2147483647, %v1681_v50  ;;  %v821_v21 = vor.u32 1.1754944e-38, %v820_v10  ;;  %vm1707_vm11 = vcmp.eq.f32.partialorder %v770_v11, 8.507059e+37 }
 0x379   :  { %v894_v37 = vadd.f32 %v1368_v36, %v893_v56  ;;  %v949_v23 = vand.u32 2147483648, %v1681_v50  ;;  %vm943_vm14 = vweird.f32 %v1681_v50 }
 0x37a   :  { %v1370_v62 = vpop.eup %1369  ;;  %873 = vst [vmem:[#allocation13 + $0x38] sm:$0xff] %v871_v61  ;;  %vm948_vm15 = vcmp.eq.f32.partialorder %v947_v16, 8.507059e+37 }
 0x37b   :  { %v898_v0 = vsel %vm897_vm3, %v1368_v36, %v894_v37  ;;  %v810_v1 = vmul.f32 %v1370_v62, %v793_v43  ;;  %v1689_v2 = vpop.xlane.xlu1 %936  ;;  %v1372_v3 = vpop.eup %1371  ;;  %vm815_vm6 = vweird.f32 %v1370_v62  ;;  %v950_v39 = vor.u32 1.1754944e-38, %v949_v23 }
 0x37c   :  { %v903_v4 = vsel %vm900_vm4, %v902_v63, %v898_v0  ;;  %v1691_v6 = vpop.xlane.xlu2 %888  ;;  %1375 = vrcp.f32 %v1689_v2  ;;  %v762_v8 = vmul.f32 %v1372_v3, %v1678_v45  ;;  %v1374_v9 = vpop.eup %1373  ;;  %vm767_vm9 = vweird.f32 %v1372_v3  ;;  %vm816_vm10 = vmor %vm814_vm5, %vm815_vm6 }
 0x37d   :  { %v904_v40 = vmul.f32 %v1647_v46, %v903_v4  ;;  %v811_v7 = vsub.f32 1.0, %v810_v1  ;;  %1377 = vrcp.f32 %v1691_v6  ;;  %v939_v14 = vmul.f32 %v1374_v9, %v1681_v50  ;;  %vm768_vm13 = vmor %vm766_vm8, %vm767_vm9 }
 0x37e   :  { %v763_v13 = vsub.f32 1.0, %v762_v8  ;;  %v772_v46 = vand.u32 2147483648, %v1678_v45  ;;  %vm944_vm12 = vweird.f32 %v1374_v9  ;;  %v916_v41 = vand.u32 2147483648, %v1691_v6 }
 0x37f   :  { %920 = vst [vmem:[#allocation13 + $0x18] sm:$0xff] %v904_v40  ;;  %v812_v12 = vmul.f32 %v1370_v62, %v811_v7  ;;  %v940_v19 = vsub.f32 1.0, %v939_v14  ;;  %vm945_vm0 = vmor %vm943_vm14, %vm944_vm12  ;;  %v962_v47 = vand.u32 2147483647, %v1689_v2  ;;  %v914_v50 = vand.u32 2147483647, %v1691_v6 }
 0x380   :  { %v764_v18 = vmul.f32 %v1372_v3, %v763_v13  ;;  %v773_v30 = vor.u32 1.1754944e-38, %v772_v46  ;;  %vm958_vm3 = vweird.f32 %v1689_v2  ;;  %vm910_vm4 = vweird.f32 %v1691_v6 }
 0x381   :  { %v813_v17 = vadd.f32 %v1370_v62, %v812_v12  ;;  %v941_v26 = vmul.f32 %v1374_v9, %v940_v19  ;;  %vm915_vm8 = vcmp.eq.f32.partialorder %v914_v50, 8.507059e+37 }
 0x382   :  { %v1376_v20 = vpop.eup %1375  ;;  %v765_v25 = vadd.f32 %v1372_v3, %v764_v18 }
 0x383   :  { %v817_v24 = vsel %vm816_vm10, %v1370_v62, %v813_v17  ;;  %v954_v27 = vmul.f32 %v1376_v20, %v1689_v2  ;;  %v1378_v28 = vpop.eup %1377  ;;  %v942_v35 = vadd.f32 %v1374_v9, %v941_v26  ;;  %vm959_vm1 = vweird.f32 %v1376_v20 }
 0x384   :  { %v822_v29 = vsel %vm1699_vm7, %v821_v21, %v817_v24  ;;  %v769_v34 = vsel %vm768_vm13, %v1372_v3, %v765_v25  ;;  %v906_v36 = vmul.f32 %v1378_v28, %v1691_v6  ;;  %vm911_vm2 = vweird.f32 %v1378_v28  ;;  %vm960_vm5 = vmor %vm958_vm3, %vm959_vm1 }
 0x385   :  { %v823_v33 = vmul.f32 %v1650_v53, %v822_v29  ;;  %v774_v38 = vsel %vm1707_vm11, %v773_v30, %v769_v34  ;;  %v955_v42 = vsub.f32 1.0, %v954_v27  ;;  %v946_v43 = vsel %vm945_vm0, %v1374_v9, %v942_v35  ;;  %vm912_vm6 = vmor %vm910_vm4, %vm911_vm2 }
 0x386   :  { %v775_v31 = vmul.f32 %v1654_v57, %v774_v38  ;;  %v907_v32 = vsub.f32 1.0, %v906_v36  ;;  %v964_v53 = vand.u32 2147483648, %v1689_v2  ;;  %v951_v44 = vsel %vm948_vm15, %v950_v39, %v946_v43 }
 0x387   :  { %825 = vst [vmem:[#allocation13 + $0x30] sm:$0xff] %v823_v33  ;;  %v956_v45 = vmul.f32 %v1376_v20, %v955_v42  ;;  %v952_v48 = vmul.f32 %v1652_v55, %v951_v44  ;;  %v917_v55 = vor.u32 1.1754944e-38, %v916_v41  ;;  %vm963_vm7 = vcmp.eq.f32.partialorder %v962_v47, 8.507059e+37 }
 0x388   :  { %777 = vst [vmem:[#allocation13 + $0x28] sm:$0xff] %v775_v31  ;;  %v908_v49 = vmul.f32 %v1378_v28, %v907_v32  ;;  %v965_v52 = vor.u32 1.1754944e-38, %v964_v53 }
 0x389   :  { %v957_v51 = vadd.f32 %v1376_v20, %v956_v45  ;;  %968 = vst [vmem:[#allocation13 + $0x20] sm:$0xff] %v952_v48 }
 0x38a   :  { %v909_v57 = vadd.f32 %v1378_v28, %v908_v49 }
 0x38b   :  { %v961_v54 = vsel %vm960_vm5, %v1376_v20, %v957_v51 }
 0x38c   :  { %v913_v56 = vsel %vm912_vm6, %v1378_v28, %v909_v57  ;;  %v966_v60 = vsel %vm963_vm7, %v965_v52, %v961_v54 }
 0x38d   :  { %v918_v61 = vsel %vm915_vm8, %v917_v55, %v913_v56  ;;  %v967_v37 = vmul.f32 %v1659_v58, %v966_v60 }
 0x38e   :  { %v919_v62 = vmul.f32 %v1661_v59, %v918_v61 }
 0x38f   :  { %969 = vst [vmem:[#allocation13 + $0x48] sm:$0xff] %v967_v37 }
 0x390   :  { %921 = vst [vmem:[#allocation13 + $0x40] sm:$0xff] %v919_v62 }
 0x391   :  { %982 = dma.vmem_to_hbm [thread:$0]  %s975_s5, 1280, %s977_s7, [#allocation4], %s1570_s8, %s1570_s8, %s1571_s9  }
 0x392   :  { %1555 = dma.done.wait [#allocation4], 1280  }
 0x393   :  { %1556 = vsyncadd [#allocation4], 4294966016 }
 0x394   :  { %987 = vsyncpa [#allocation3], 1 }
 0x395   :  { %988 = vsyncpa [#allocation6], 1 }
 0x396   :  { %989 = vsyncpa [#allocation9], 1 }
 0x397   :  { %990 = vsyncpa [#allocation12], 1 }
 0x398   :  { %991 = vsyncpa [#allocation4], 1 }

</bundles_post_ra>
